<compile_context>
chip_gen: v7x
topology: tpu7x:2x2x1
jax: 0.10.0
libtpu: 0.0.40
codegen_flags: <defaults>
</compile_context>

<pallas_src>
import math

import jax
import jax.numpy as jnp
from jax.experimental import pallas as pl
from jax.experimental.pallas import tpu as pltpu

FEAT = 32        # config.feat_size
MAX_LEN = 64     # config.encoder_max_sequence_length


# ------------------------- pe buffer (register_buffer) -------------------------

def make_pe(max_len, feat):
    """Exact replica of the PyTorch buffer (note the 2_000_000 frequency base,
    as written in the reference module)."""
    pos = jnp.arange(max_len, dtype=jnp.float32)[:, None]
    div = jnp.exp(jnp.arange(0, feat, 2, dtype=jnp.float32)
                  * (-math.log(2000000.0) / feat))
    pe = jnp.zeros((max_len, feat), jnp.float32)
    pe = pe.at[:, 0::2].set(jnp.sin(pos * div))
    pe = pe.at[:, 1::2].set(jnp.cos(pos * div))
    return pe


# ------------------------------ Pallas kernel ---------------------------------

def _pe_add_kernel(x_ref, enc_ref, o_ref):
    # x_ref: (TB, S*D) batch slab, enc_ref: (1, S*D) shared encoding row.
    # Single VPU add; enc broadcasts across the sublane (batch) axis.
    o_ref[...] = x_ref[...] + enc_ref[...]


def _pick_batch_tile(batch, row_bytes, target_bytes=1 << 20):
    """Largest batch tile with block <= ~1 MiB, sublane-friendly, exact grid."""
    tb = max(1, min(batch, target_bytes // max(1, row_bytes)))
    if tb >= batch:
        return batch                      # whole tensor in one VMEM block
    tb = max(8, (tb // 8) * 8)            # keep sublanes full when tiling
    while tb > 0 and batch % tb:
        tb -= 8
    return tb if tb > 0 else batch        # fallback: single full block


def _pe_add(x, enc):
    """x: (B, S, D) f32, enc: (S, D) f32 broadcast over batch -> (B, S, D)."""
    B, S, D = x.shape
    flat = S * D
    # (B, flat) view: sublane = batch, lane = S*D.  If flat % 128 != 0 the
    # stores become masked vst.msk (still correct, just slower); at the demo
    # config flat = 512 so stores are unmasked 128-lane vst.
    x2 = x.reshape(B, flat)                       # free metadata reshape
    enc2 = enc.reshape(1, flat)

    tb = _pick_batch_tile(B, flat * x.dtype.itemsize)
    grid = (B // tb,)

    out = pl.pallas_call(
        _pe_add_kernel,
        out_shape=jax.ShapeDtypeStruct((B, flat), x.dtype),
        grid=grid,
        in_specs=[pl.BlockSpec((tb, flat), lambda i: (i, 0)),
                  pl.BlockSpec((1, flat), lambda i: (0, 0))],
        out_specs=pl.BlockSpec((tb, flat), lambda i: (i, 0)),
        compiler_params=pltpu.CompilerParams(
            dimension_semantics=("parallel",)),   # megacore split when B is big
    )(x2, enc2)
    return out.reshape(B, S, D)


# --------------------------------- module --------------------------------------

class PositionalEncoding:
    """Eval-mode functional mirror of the PyTorch module, with the positional
    encoding precomputed once per (seq_len, width) and cached."""

    def __init__(self, feat_size=FEAT, max_len=MAX_LEN, use_row_embeddings=True):
        self.pe = make_pe(max_len, feat_size)     # register_buffer('pe', ...)
        self.use_row_embeddings = use_row_embeddings
        self._enc_cache = {}

    def _encoding(self, seq_len, width):
        key = (seq_len, width if self.use_row_embeddings else None)
        if key not in self._enc_cache:
            if width is not None and self.use_row_embeddings:
                assert seq_len % width == 0
                height = seq_len // width
                # self.pe[:, :width].repeat(1, height, 1)
                #   + repeat_interleave(self.pe[:, :height], width, dim=1), / 2
                row = jnp.tile(self.pe[:width], (height, 1))       # (S, D)
                col = jnp.repeat(self.pe[:height], width, axis=0)  # (S, D)
                enc = 0.5 * (row + col)
            else:
                enc = self.pe[:seq_len]
            self._enc_cache[key] = jax.device_put(enc)
        return self._enc_cache[key]

    def __call__(self, x, width=None):
        enc = self._encoding(x.shape[1], width)
        return _pe_add(x, enc)                    # dropout: eval-mode identity


# ---------------------------------- main ---------------------------------------

if __name__ == "__main__":
    key = jax.random.PRNGKey(0)
    B, S = 2, 16
    x = jax.random.normal(key, (B, S, FEAT), jnp.float32)

    mod = PositionalEncoding(feat_size=FEAT, max_len=MAX_LEN, use_row_embeddings=True)
    pe = mod.pe

    # Path 1: width=None (standard sequence positional encoding).
    out_plain = jax.block_until_ready(mod(x, width=None))
    ref_plain = x + pe[None, :S, :]
    assert out_plain.shape == (B, S, FEAT)
    assert bool(jnp.allclose(out_plain, ref_plain, atol=1e-6))
    assert bool(jnp.all(jnp.isfinite(out_plain)))

    # Path 2: width given + use_row_embeddings (row/column 2-D positional encoding).
    width = 8
    height = S // width
    out_row = jax.block_until_ready(mod(x, width=width))
    ref_row = x + 0.5 * (jnp.tile(pe[:width], (height, 1))
                         + jnp.repeat(pe[:height], width, axis=0))[None]
    assert out_row.shape == (B, S, FEAT)
    assert bool(jnp.allclose(out_row, ref_row, atol=1e-6))
    assert bool(jnp.all(jnp.isfinite(out_row)))

    # Second call hits the encoding cache (no per-forward tile/repeat HLOs).
    out_row2 = jax.block_until_ready(mod(x, width=width))
    assert bool(jnp.allclose(out_row2, ref_row, atol=1e-6))

    print("KERNEL_OK")
</pallas_src>

<mosaic_0001>
module attributes {stable_mosaic.version = 11 : i64} {
  func.func @_pe_add_kernel(%arg0: i32, %arg1: memref<2x512xf32, #tpu.memory_space<vmem>>, %arg2: memref<1x512xf32, #tpu.memory_space<vmem>>, %arg3: memref<2x512xf32, #tpu.memory_space<vmem>>) attributes {dimension_semantics = [#tpu.dimension_semantics<parallel>], iteration_bounds = array<i64: 1>, scalar_prefetch = 0 : i64, scratch_operands = 0 : i64, tpu.core_type = #tpu.core_type<tc>, window_params = [{transform_indices = @transform_0, window_bounds = array<i64: 2, 512>}, {pipeline_mode = #tpu.pipeline_mode<synchronous>, transform_indices = @transform_1, window_bounds = array<i64: 1, 512>}, {transform_indices = @transform_2, window_bounds = array<i64: 2, 512>}]} {
    %c0 = arith.constant 0 : index
    %c0_0 = arith.constant 0 : index
    %0 = vector.load %arg1[%c0, %c0_0] : memref<2x512xf32, #tpu.memory_space<vmem>>, vector<2x512xf32>
    %c0_1 = arith.constant 0 : index
    %c0_2 = arith.constant 0 : index
    %1 = vector.load %arg2[%c0_1, %c0_2] : memref<1x512xf32, #tpu.memory_space<vmem>>, vector<1x512xf32>
    %2 = vector.broadcast %1 : vector<1x512xf32> to vector<2x512xf32>
    %3 = arith.addf %0, %2 : vector<2x512xf32>
    %c0_3 = arith.constant 0 : index
    %c0_4 = arith.constant 0 : index
    %4 = vector.load %arg3[%c0_3, %c0_4] : memref<2x512xf32, #tpu.memory_space<vmem>>, vector<2x512xf32>
    tpu.vector_store %arg3[%c0_3, %c0_4], %3 {strides = array<i32>} : memref<2x512xf32, #tpu.memory_space<vmem>>, vector<2x512xf32>,
    return
  }
  func.func @transform_0(%arg0: i32) -> (i32, i32) {
    %c0_i32 = arith.constant 0 : i32
    %c0_i32_0 = arith.constant 0 : i32
    return %arg0, %c0_i32 : i32, i32
  }
  func.func @transform_1(%arg0: i32) -> (i32, i32) {
    %c0_i32 = arith.constant 0 : i32
    %c0_i32_0 = arith.constant 0 : i32
    %c0_i32_1 = arith.constant 0 : i32
    return %c0_i32, %c0_i32_0 : i32, i32
  }
  func.func @transform_2(%arg0: i32) -> (i32, i32) {
    %c0_i32 = arith.constant 0 : i32
    %c0_i32_0 = arith.constant 0 : i32
    return %arg0, %c0_i32 : i32, i32
  }
}

</mosaic_0001>

<bundles_post_ra>
// kernel: tpu_custom_call.1
= control target key start
LH: loop header
LB: loop body
LE: loop exit
PB: predicated region body
PF: predicated region fallthrough
CT: control target
= control target key end

     0   :  { %7 = vsyncpa [#allocation3], 0  ;;  %s222_s0 = inlined_call_operand.hbm [shape: f32[2,512], index: 0, kind: input, shape index: {}]   ;;  %s223_s1 = inlined_call_operand.hbm [shape: f32[1,512], index: 1, kind: input, shape index: {}]   ;;  %s224_s2 = inlined_call_operand.hbm [shape: f32[2,512], index: 2, kind: output, shape index: {}]  }
   0x1   :  { %8 = vsyncpa [#allocation6], 0 }
   0x2   :  { %9 = vsyncpa [#allocation4], 0  ;;  %s167_s9 = smov [#allocation2]   ;;  %s168_s11 = smov [#allocation5]  }
   0x3   :  { %s16_s10 = sshll.u32 %s167_s9, 4  ;;  %s26_s12 = sshll.u32 %s168_s11, 4  ;;  %s17_s10 = int_to_ptr.vmem [resolvable:$true] %s16_s10  ;;  %s27_s12 = int_to_ptr.vmem [resolvable:$true] %s26_s12 }
   0x4   :  { %s95_s15 = scalar_lea.hbm %s222_s0, 128 }
   0x5   :  { %p96_p0 = scmp.ne.s32.totalorder %s222_s0, %s95_s15  ;;  %p99_p1 = scmp.lt.u32.totalorder %s95_s15, %s222_s0 }
   0x7   :  { %p101_p2 = pnand %p99_p1, %p96_p0 }
   0x9   :  { %104 = shalt.err (!%p101_p2)
}
   0xa   :  { %s105_s20 = scalar_lea.vmem %s17_s10, 128  ;;  %p110_p4 = scmp.lt.s32.totalorder %s17_s10, %s17_s10 }
   0xb   :  { %p106_p3 = scmp.ne.s32.totalorder %s17_s10, %s105_s20  ;;  %p111_p5 = scmp.lt.s32.totalorder %s105_s20, %s105_s20 }
   0xd   :  { %p112_p6 = por %p111_p5, %p110_p4 }
   0xf   :  { %p113_p7 = pnand %p112_p6, %p106_p3 }
  0x11   :  { %116 = shalt.err (!%p113_p7)
}
  0x12   :  { %19 = dma.hbm_to_vmem [thread:$0]  %s222_s0, 128, %s17_s10, [#allocation3]  }
  0x13   :  { %s117_s25 = scalar_lea.hbm %s223_s1, 64 }
  0x14   :  { %p118_p8 = scmp.ne.s32.totalorder %s223_s1, %s117_s25  ;;  %p121_p9 = scmp.lt.u32.totalorder %s117_s25, %s223_s1 }
  0x16   :  { %p123_p10 = pnand %p121_p9, %p118_p8 }
  0x18   :  { %126 = shalt.err (!%p123_p10)
}
  0x19   :  { %s127_s30 = scalar_lea.vmem %s27_s12, 64  ;;  %p132_p12 = scmp.lt.s32.totalorder %s27_s12, %s27_s12 }
  0x1a   :  { %p128_p11 = scmp.ne.s32.totalorder %s27_s12, %s127_s30  ;;  %p133_p13 = scmp.lt.s32.totalorder %s127_s30, %s127_s30 }
  0x1c   :  { %p134_p0 = por %p133_p13, %p132_p12 }
  0x1e   :  { %p135_p1 = pnand %p134_p0, %p128_p11 }
  0x20   :  { %138 = shalt.err (!%p135_p1)
}
  0x21   :  { %29 = dma.hbm_to_vmem [thread:$0]  %s223_s1, 64, %s27_s12, [#allocation6]  }
  0x22   :  { %161 = dma.done.wait [#allocation3], 128  }
  0x23   :  { %162 = vsyncadd [#allocation3], 4294967168 }
  0x24   :  { %163 = dma.done.wait [#allocation6], 64  }
  0x25   :  { %164 = vsyncadd [#allocation6], 4294967232  ;;  %v39_v0 = vlaneseq  ;;  %v169_v1 = vmov 1983009808   ;;  %v37_v9 = vld [vmem:[#allocation5] sm:$0xf] }
  0x26   :  { %v58_v2 = vunpack.c.l.s4 %v169_v1  ;;  %v36_v19 = vld [vmem:[#allocation2] sm:$0xff]  ;;  %s170_s1 = smov [#allocation7]  }
  0x27   :  { %v40_v3 = vshrl.u32 %v39_v0, 7  ;;  %s81_s4 = sshll.u32 %s170_s1, 4  ;;  %s82_s4 = int_to_ptr.vmem [resolvable:$true] %s81_s4 }
  0x28   :  { %v59_v4 = vunpack.c.0.s8 %v58_v2  ;;  %s139_s5 = scalar_lea.vmem %s82_s4, 128  ;;  %p144_p3 = scmp.lt.s32.totalorder %s82_s4, %s82_s4 }
  0x29   :  { %v41_v5 = vsub.s32 0, %v40_v3  ;;  %v45_v6 = vsub.s32 1, %v40_v3  ;;  %v49_v7 = vsub.s32 2, %v40_v3  ;;  %v53_v8 = vsub.s32 3, %v40_v3  ;;  %p140_p2 = scmp.ne.s32.totalorder %s82_s4, %s139_s5  ;;  %p145_p4 = scmp.lt.s32.totalorder %s139_s5, %s139_s5 }
  0x2a   :  { %v62_v10 = vsub.s32 %v59_v4, %v40_v3 }
  0x2b   :  { %v42_v11 = vrot.slane %v37_v9, %v41_v5  ;;  %v46_v12 = vrot.slane %v37_v9, %v45_v6  ;;  %v50_v13 = vrot.slane %v37_v9, %v49_v7  ;;  %v54_v14 = vrot.slane %v37_v9, %v53_v8  ;;  %p146_p5 = por %p145_p4, %p144_p3 }
  0x2d   :  { %v55_v15 = vcombine.low %v42_v11, %v46_v12  ;;  %v56_v16 = vcombine.low %v50_v13, %v54_v14  ;;  %p147_p6 = pnand %p146_p5, %p140_p2 }
  0x2f   :  { %v63_v17 = vrot.slane %v55_v15, %v62_v10  ;;  %v70_v18 = vrot.slane %v56_v16, %v62_v10 }
  0x31   :  { %v71_v20 = vcombine.low %v63_v17, %v70_v18 }
  0x33   :  { %v73_v21 = vadd.f32 %v71_v20, %v36_v19 }
  0x35   :  { %74 = vst [vmem:[#allocation7] sm:$0xff] %v73_v21 }
  0x36   :  { %150 = shalt.err (!%p147_p6)
}
  0x37   :  { %s151_s8 = scalar_lea.hbm %s224_s2, 128 }
  0x38   :  { %p152_p7 = scmp.ne.s32.totalorder %s224_s2, %s151_s8  ;;  %p155_p8 = scmp.lt.u32.totalorder %s151_s8, %s224_s2 }
  0x3a   :  { %p157_p9 = pnand %p155_p8, %p152_p7 }
  0x3c   :  { %160 = shalt.err (!%p157_p9)
}
  0x3d   :  { %84 = dma.vmem_to_hbm [thread:$0]  %s82_s4, 128, %s224_s2, [#allocation4]  }
  0x3e   :  { %165 = dma.done.wait [#allocation4], 128  }
  0x3f   :  { %166 = vsyncadd [#allocation4], 4294967168 }
  0x40   :  { %88 = vsyncpa [#allocation3], 1 }
  0x41   :  { %89 = vsyncpa [#allocation6], 1 }
  0x42   :  { %90 = vsyncpa [#allocation4], 1 }

</bundles_post_ra>
